<compile_context>
chip_gen: v6e
topology: v6e:2x2x1
jax: 0.10.0
libtpu: 0.0.40
codegen_flags: <defaults>
</compile_context>

<pallas_src>
import jax
import jax.numpy as jnp
from jax.experimental import pallas as pl
from jax.experimental.pallas import tpu as pltpu


# --------------------------------------------------------------------------
# small helpers
# --------------------------------------------------------------------------
def _round_up(x, m):
    return ((x + m - 1) // m) * m


def _pad_to(a, shape):
    pads = [(0, t - s) for s, t in zip(a.shape, shape)]
    if any(p for _, p in pads):
        a = jnp.pad(a, pads)
    return a


# --------------------------------------------------------------------------
# kernels
# --------------------------------------------------------------------------
def _shared_kernel(x_ref, w_ref, b_ref, o_ref, acc_ref):
    # grid = (row tiles [parallel], nf tiles [arbitrary / reduction])
    k = pl.program_id(1)

    @pl.when(k == 0)
    def _():
        acc_ref[...] = jnp.zeros_like(acc_ref)

    acc_ref[...] += jnp.dot(x_ref[...], w_ref[...],
                            preferred_element_type=jnp.float32)

    @pl.when(k == pl.num_programs(1) - 1)
    def _():
        o_ref[...] = (acc_ref[...] + b_ref[...]).astype(o_ref.dtype)


def _individual_kernel(x_ref, w_ref, b_ref, o_ref):
    # blocks: x (tb, V, nf), w (V, nf, T), b (V, T), o (tb, V, T)
    # All vars are handled in one grid step (static unroll over V) so the
    # ~0.35us per-step pipeline overhead is amortized and there are no
    # wrapper-side transposes.
    n_vars = w_ref.shape[0]
    for v in range(n_vars):
        o_ref[:, v, :] = (
            jnp.dot(x_ref[:, v, :], w_ref[v],
                    preferred_element_type=jnp.float32)
            + b_ref[v]
        ).astype(o_ref.dtype)


def _cluster_kernel(x_ref, w_ref, b_ref, p_ref, o_ref):
    # grid = (row tiles [parallel], clusters k [arbitrary / reduction])
    # o_ref (f32) doubles as the accumulator: its block index is constant
    # over k, so it stays VMEM-resident across the whole reduction.
    k = pl.program_id(1)

    @pl.when(k == 0)
    def _():
        o_ref[...] = jnp.zeros_like(o_ref)

    z = jnp.dot(x_ref[...], w_ref[0],
                preferred_element_type=jnp.float32) + b_ref[0]

    # prob is a lane-dense resident (tm, K) block; select column k via a
    # masked lane-reduction (avoids dynamic lane slicing).
    p = p_ref[...]
    col = jax.lax.broadcasted_iota(jnp.int32, p.shape, 1)
    p_k = jnp.sum(jnp.where(col == k, p, 0.0), axis=1, keepdims=True)  # (tm, 1)

    o_ref[...] += p_k * z


# --------------------------------------------------------------------------
# wrappers (glue: reshapes / zero padding only)
# --------------------------------------------------------------------------
def flatten_head_shared(x, w, b, *, compute_dtype=jnp.bfloat16):
    """individual not in ('i','c'): shared nn.Linear(nf, T) over all vars."""
    B, V, D, P = x.shape
    nf = D * P
    T = w.shape[1]
    R = B * V

    # tile sizes: rows multiple of 8, nf tiles multiple of 128
    tm = _round_up(R, 8) if R <= 512 else 256
    nf128 = _round_up(nf, 128)
    tk = nf128 if nf128 <= 1024 else 512
    R_pad = _round_up(R, tm)
    nf_pad = _round_up(nf, tk)

    xp = _pad_to(x.reshape(R, nf), (R_pad, nf_pad)).astype(compute_dtype)
    wp = _pad_to(w, (nf_pad, T)).astype(compute_dtype)
    b2 = b.reshape(1, T).astype(jnp.float32)

    out = pl.pallas_call(
        _shared_kernel,
        out_shape=jax.ShapeDtypeStruct((R_pad, T), x.dtype),
        grid=(R_pad // tm, nf_pad // tk),
        in_specs=[
            pl.BlockSpec((tm, tk), lambda i, k: (i, k)),
            pl.BlockSpec((tk, T), lambda i, k: (k, 0)),
            pl.BlockSpec((1, T), lambda i, k: (0, 0)),
        ],
        out_specs=pl.BlockSpec((tm, T), lambda i, k: (i, 0)),
        scratch_shapes=[pltpu.VMEM((tm, T), jnp.float32)],
        compiler_params=pltpu.CompilerParams(
            dimension_semantics=("parallel", "arbitrary"),
            vmem_limit_bytes=32 * 1024 * 1024,
        ),
    )(xp, wp, b2)
    return out[:R].reshape(B, V, T)


def flatten_head_individual(x, w, b, *, compute_dtype=jnp.bfloat16):
    """individual == 'i': one nn.Linear(nf, T) per variable."""
    B, V, D, P = x.shape
    nf = D * P
    T = w.shape[-1]
    nf_pad = _round_up(nf, 128)

    # batch tile; keep the double-buffered x block small (<= ~4 MiB)
    max_x_block_bytes = 4 * 1024 * 1024
    tb = max(1, min(B, 128, max_x_block_bytes // max(1, V * nf_pad * 2)))
    B_pad = _round_up(B, tb)

    xp = _pad_to(x.reshape(B, V, nf), (B_pad, V, nf_pad)).astype(compute_dtype)
    wp = _pad_to(w, (V, nf_pad, T)).astype(compute_dtype)
    b2 = b.astype(jnp.float32)

    out = pl.pallas_call(
        _individual_kernel,
        out_shape=jax.ShapeDtypeStruct((B_pad, V, T), x.dtype),
        grid=(B_pad // tb,),
        in_specs=[
            pl.BlockSpec((tb, V, nf_pad), lambda i: (i, 0, 0)),
            pl.BlockSpec((V, nf_pad, T), lambda i: (0, 0, 0)),
            pl.BlockSpec((V, T), lambda i: (0, 0)),
        ],
        out_specs=pl.BlockSpec((tb, V, T), lambda i: (i, 0, 0)),
        compiler_params=pltpu.CompilerParams(
            dimension_semantics=("parallel",),
            vmem_limit_bytes=32 * 1024 * 1024,
        ),
    )(xp, wp, b2)
    return out[:B]


def flatten_head_cluster(x, prob, w, b, *, compute_dtype=jnp.bfloat16):
    """individual == 'c': Cluster_wise_linear — K linears mixed by prob (B, K)."""
    B, V, D, P = x.shape
    nf = D * P
    K, _, T = w.shape
    R = B * V

    tm = _round_up(R, 8) if R <= 512 else 256
    R_pad = _round_up(R, tm)
    nf_pad = _round_up(nf, 128)

    xp = _pad_to(x.reshape(R, nf), (R_pad, nf_pad)).astype(compute_dtype)
    wp = _pad_to(w, (K, nf_pad, T)).astype(compute_dtype)
    b3 = b.reshape(K, 1, T).astype(jnp.float32)
    # per-row mixing weights: row (b, v) uses prob[b, :]   -> (R_pad, K), lane-dense
    pp = _pad_to(jnp.repeat(prob, V, axis=0), (R_pad, K)).astype(jnp.float32)

    out = pl.pallas_call(
        _cluster_kernel,
        out_shape=jax.ShapeDtypeStruct((R_pad, T), jnp.float32),
        grid=(R_pad // tm, K),
        in_specs=[
            pl.BlockSpec((tm, nf_pad), lambda i, k: (i, 0)),      # resident over k
            pl.BlockSpec((1, nf_pad, T), lambda i, k: (k, 0, 0)),
            pl.BlockSpec((1, 1, T), lambda i, k: (k, 0, 0)),
            pl.BlockSpec((tm, K), lambda i, k: (i, 0)),           # resident over k
        ],
        out_specs=pl.BlockSpec((tm, T), lambda i, k: (i, 0)),
        compiler_params=pltpu.CompilerParams(
            dimension_semantics=("parallel", "arbitrary"),
            vmem_limit_bytes=32 * 1024 * 1024,
        ),
    )(xp, wp, b3, pp)
    return out[:R].astype(x.dtype).reshape(B, V, T)


# --------------------------------------------------------------------------
# main
# --------------------------------------------------------------------------
if __name__ == "__main__":
    B, V, D, P = 2, 4, 16, 8            # batch, n_vars, d_model, patch_num
    nf = D * P                          # 128
    T = 16                              # target_window
    K = 3                               # n_cluster

    key = jax.random.PRNGKey(0)
    kx, kp, kw0, kb0, kwi, kbi, kwc, kbc = jax.random.split(key, 8)

    x = jax.random.normal(kx, (B, V, D, P), dtype=jnp.float32)
    prob = jax.nn.softmax(jax.random.normal(kp, (B, K), dtype=jnp.float32), axis=-1)

    # deterministic synthetic parameters (shapes match nn.Linear(nf, T))
    w_shared = jax.random.normal(kw0, (nf, T), dtype=jnp.float32) * 0.05
    b_shared = jax.random.normal(kb0, (T,), dtype=jnp.float32) * 0.05
    w_indiv = jax.random.normal(kwi, (V, nf, T), dtype=jnp.float32) * 0.05
    b_indiv = jax.random.normal(kbi, (V, T), dtype=jnp.float32) * 0.05
    w_clust = jax.random.normal(kwc, (K, nf, T), dtype=jnp.float32) * 0.05
    b_clust = jax.random.normal(kbc, (K, T), dtype=jnp.float32) * 0.05

    x_flat = x.reshape(B, V, nf)
    # bf16 MXU operands -> compare against full-f32 references with bf16-level tolerance
    TOL = dict(atol=3e-2, rtol=3e-2)

    # ---- shared head ----
    out_s = jax.block_until_ready(flatten_head_shared(x, w_shared, b_shared))
    ref_s = jnp.einsum("bvn,nt->bvt", x_flat, w_shared) + b_shared
    assert out_s.shape == (B, V, T)
    assert jnp.allclose(out_s, ref_s, **TOL)

    # ---- individual ('i') head ----
    out_i = jax.block_until_ready(flatten_head_individual(x, w_indiv, b_indiv))
    ref_i = jnp.einsum("bvn,vnt->bvt", x_flat, w_indiv) + b_indiv[None, :, :]
    assert out_i.shape == (B, V, T)
    assert jnp.allclose(out_i, ref_i, **TOL)

    # ---- cluster ('c') head ----
    out_c = jax.block_until_ready(flatten_head_cluster(x, prob, w_clust, b_clust))
    ref_c = jnp.einsum(
        "bk,bvkt->bvt",
        prob,
        jnp.einsum("bvn,knt->bvkt", x_flat, w_clust) + b_clust[None, None, :, :],
    )
    assert out_c.shape == (B, V, T)
    assert jnp.allclose(out_c, ref_c, **TOL)

    # TODO(synk): nn.Dropout(head_dropout) is identity for p=0 / eval and is omitted.
    print("KERNEL_OK")
</pallas_src>

<mosaic_0001>
module attributes {stable_mosaic.version = 11 : i64} {
  func.func @_shared_kernel(%arg0: i32, %arg1: i32, %arg2: memref<8x128xbf16, #tpu.memory_space<vmem>>, %arg3: memref<128x16xbf16, #tpu.memory_space<vmem>>, %arg4: memref<1x16xf32, #tpu.memory_space<vmem>>, %arg5: memref<8x16xf32, #tpu.memory_space<vmem>>, %arg6: memref<8x16xf32, #tpu.memory_space<vmem>>) attributes {dimension_semantics = [#tpu.dimension_semantics<parallel>, #tpu.dimension_semantics<arbitrary>], iteration_bounds = array<i64: 1, 1>, scalar_prefetch = 0 : i64, scratch_operands = 1 : i64, tpu.core_type = #tpu.core_type<tc>, window_params = [{transform_indices = @transform_0, window_bounds = array<i64: 8, 128>}, {transform_indices = @transform_1, window_bounds = array<i64: 128, 16>}, {pipeline_mode = #tpu.pipeline_mode<synchronous>, transform_indices = @transform_2, window_bounds = array<i64: 1, 16>}, {transform_indices = @transform_3, window_bounds = array<i64: 8, 16>}]} {
    %c0_i32 = arith.constant 0 : i32
    %0 = arith.cmpi eq, %arg1, %c0_i32 : i32
    %1 = arith.extui %0 : i1 to i32
    %c0_i32_0 = arith.constant 0 : i32
    %2 = arith.cmpi ne, %1, %c0_i32_0 : i32
    scf.if %2 {
      %cst_10 = arith.constant 0.000000e+00 : f32
      %12 = vector.broadcast %cst_10 : f32 to vector<8x16xf32>
      %c0_11 = arith.constant 0 : index
      %c0_12 = arith.constant 0 : index
      %13 = vector.load %arg6[%c0_11, %c0_12] : memref<8x16xf32, #tpu.memory_space<vmem>>, vector<8x16xf32>
      tpu.vector_store %arg6[%c0_11, %c0_12], %12 {strides = array<i32>} : memref<8x16xf32, #tpu.memory_space<vmem>>, vector<8x16xf32>,
    } else {
    }
    %c0 = arith.constant 0 : index
    %c0_1 = arith.constant 0 : index
    %3 = vector.load %arg6[%c0, %c0_1] : memref<8x16xf32, #tpu.memory_space<vmem>>, vector<8x16xf32>
    %c0_2 = arith.constant 0 : index
    %c0_3 = arith.constant 0 : index
    %4 = vector.load %arg2[%c0_2, %c0_3] : memref<8x128xbf16, #tpu.memory_space<vmem>>, vector<8x128xbf16>
    %c0_4 = arith.constant 0 : index
    %c0_5 = arith.constant 0 : index
    %5 = vector.load %arg3[%c0_4, %c0_5] : memref<128x16xbf16, #tpu.memory_space<vmem>>, vector<128x16xbf16>
    %cst = arith.constant dense<0.000000e+00> : vector<8x16xf32>
    %6 = tpu.matmul %4, %5, %cst {dimension_numbers = #tpu.dot_dimension_numbers<[1], [0], [0], [1], [0, 0, 1, 1], [], []>} : vector<8x128xbf16>, vector<128x16xbf16>, vector<8x16xf32> -> vector<8x16xf32>
    %7 = arith.addf %3, %6 : vector<8x16xf32>
    %c0_6 = arith.constant 0 : index
    %c0_7 = arith.constant 0 : index
    %8 = vector.load %arg6[%c0_6, %c0_7] : memref<8x16xf32, #tpu.memory_space<vmem>>, vector<8x16xf32>
    tpu.vector_store %arg6[%c0_6, %c0_7], %7 {strides = array<i32>} : memref<8x16xf32, #tpu.memory_space<vmem>>, vector<8x16xf32>,
    %c0_i32_8 = arith.constant 0 : i32
    %9 = arith.cmpi eq, %arg1, %c0_i32_8 : i32
    %10 = arith.extui %9 : i1 to i32
    %c0_i32_9 = arith.constant 0 : i32
    %11 = arith.cmpi ne, %10, %c0_i32_9 : i32
    scf.if %11 {
      %c0_10 = arith.constant 0 : index
      %c0_11 = arith.constant 0 : index
      %12 = vector.load %arg6[%c0_10, %c0_11] : memref<8x16xf32, #tpu.memory_space<vmem>>, vector<8x16xf32>
      %c0_12 = arith.constant 0 : index
      %c0_13 = arith.constant 0 : index
      %13 = vector.load %arg4[%c0_12, %c0_13] : memref<1x16xf32, #tpu.memory_space<vmem>>, vector<1x16xf32>
      %14 = vector.broadcast %13 : vector<1x16xf32> to vector<8x16xf32>
      %15 = arith.addf %12, %14 : vector<8x16xf32>
      %c0_14 = arith.constant 0 : index
      %c0_15 = arith.constant 0 : index
      %16 = vector.load %arg5[%c0_14, %c0_15] : memref<8x16xf32, #tpu.memory_space<vmem>>, vector<8x16xf32>
      tpu.vector_store %arg5[%c0_14, %c0_15], %15 {strides = array<i32>} : memref<8x16xf32, #tpu.memory_space<vmem>>, vector<8x16xf32>,
    } else {
    }
    return
  }
  func.func @transform_0(%arg0: i32, %arg1: i32) -> (i32, i32) {
    %c0_i32 = arith.constant 0 : i32
    return %arg0, %arg1 : i32, i32
  }
  func.func @transform_1(%arg0: i32, %arg1: i32) -> (i32, i32) {
    %c0_i32 = arith.constant 0 : i32
    %c0_i32_0 = arith.constant 0 : i32
    return %arg1, %c0_i32 : i32, i32
  }
  func.func @transform_2(%arg0: i32, %arg1: i32) -> (i32, i32) {
    %c0_i32 = arith.constant 0 : i32
    %c0_i32_0 = arith.constant 0 : i32
    %c0_i32_1 = arith.constant 0 : i32
    return %c0_i32, %c0_i32_0 : i32, i32
  }
  func.func @transform_3(%arg0: i32, %arg1: i32) -> (i32, i32) {
    %c0_i32 = arith.constant 0 : i32
    %c0_i32_0 = arith.constant 0 : i32
    return %arg0, %c0_i32 : i32, i32
  }
}

</mosaic_0001>

<bundles_post_ra>
// kernel: tpu_custom_call.1
= control target key start
LH: loop header
LB: loop body
LE: loop exit
PB: predicated region body
PF: predicated region fallthrough
CT: control target
= control target key end

     0   :  { %v229_v1 = vmov 0.0   ;;  %vm230_vm0 = vmmov 0   ;;  %vm20_vm1 = vcmask 130048   ;;  %s288_s0 = inlined_call_operand.vmem [shape: bf16[8,128], index: 0, kind: input, shape index: {}]   ;;  %s289_s1 = inlined_call_operand.vmem [shape: bf16[128,16], index: 1, kind: input, shape index: {}]   ;;  %s290_s2 = inlined_call_operand.vmem [shape: f32[1,16], index: 2, kind: input, shape index: {}]   ;;  %s291_s3 = inlined_call_operand.hbm [shape: f32[8,16], index: 3, kind: output, shape index: {}]  }
   0x1   :  { %v199_v0 = vld [vmem:[%s289_s1 + $0x38] sm:$0xff]   ;;  %176 = vmatprep.subr.bf16.mxu0 %v229_v1  ;;  %v200_v2 = vld [vmem:[%s289_s1 + $0x30] sm:$0xff]   ;;  %192 = vmatprep.mubr.msk.bf16.mxu0 %vm230_vm0, %v229_v1  ;;  %21 = vst.msk [vmem:[#allocation2] sm:$0xff] %vm20_vm1, %v229_v1  ;;  %v201_v3 = vld [vmem:[%s289_s1 + $0x28] sm:$0xff]  }
   0x2   :  { %177 = vmatpush3.bf16.msra.mxu0 %v199_v0 }
   0x3   :  { %178 = vmatprep.subr.bf16.mxu0 %v229_v1 }
   0x6   :  { %179 = vmatpush3.bf16.msra.mxu0 %v200_v2 }
   0x7   :  { %180 = vmatprep.subr.bf16.mxu0 %v229_v1 }
   0x8   :  { %8 = vsyncpa [#allocation4], 0  ;;  %v202_v4 = vld [vmem:[%s289_s1 + $0x20] sm:$0xff]   ;;  %v203_v5 = vld [vmem:[%s289_s1 + $0x18] sm:$0xff]  }
   0x9   :  { %v204_v6 = vld [vmem:[%s289_s1 + $0x10] sm:$0xff]   ;;  %v205_v7 = vld [vmem:[%s289_s1 + $0x8] sm:$0xff]   ;;  %v206_v8 = vld [vmem:[%s289_s1] sm:$0xff]   ;;  %s231_s1 = smov [#allocation3]  }
   0xa   :  { %181 = vmatpush3.bf16.msra.mxu0 %v201_v3  ;;  %v23_v9 = vld [vmem:[%s288_s0] sm:$0xf]  ;;  %s150_s5 = sshll.u32 %s231_s1, 4  ;;  %s151_s5 = int_to_ptr.vmem [resolvable:$true] %s150_s5 }
   0xb   :  { %182 = vmatprep.subr.bf16.mxu0 %v229_v1  ;;  %v22_v10 = vld [vmem:[#allocation2] sm:$0xff]  ;;  %s207_s0 = scalar_lea.vmem %s151_s5, 128  ;;  %p212_p1 = scmp.lt.s32.totalorder %s151_s5, %s151_s5 }
   0xc   :  { %v166_v16 = vld [vmem:[%s290_s2] ss:$0 sm:$0xff]  ;;  %p208_p0 = scmp.ne.s32.totalorder %s151_s5, %s207_s0  ;;  %p213_p2 = scmp.lt.s32.totalorder %s207_s0, %s207_s0 }
   0xe   :  { %183 = vmatpush3.bf16.msra.mxu0 %v202_v4  ;;  %p214_p3 = por %p213_p2, %p212_p1 }
   0xf   :  { %184 = vmatprep.subr.bf16.mxu0 %v229_v1 }
  0x10   :  { %p215_p4 = pnand %p214_p3, %p208_p0 }
  0x12   :  { %185 = vmatpush3.bf16.msra.mxu0 %v203_v5 }
  0x13   :  { %186 = vmatprep.subr.bf16.mxu0 %v229_v1 }
  0x16   :  { %187 = vmatpush3.bf16.msra.mxu0 %v204_v6 }
  0x17   :  { %188 = vmatprep.subr.bf16.mxu0 %v229_v1 }
  0x1a   :  { %189 = vmatpush3.bf16.msra.mxu0 %v205_v7 }
  0x1b   :  { %190 = vmatprep.subr.bf16.mxu0 %v229_v1 }
  0x1e   :  { %191 = vmatpush3.bf16.msra.mxu0 %v206_v8 }
  0x21   :  { %193 = vmatmul.mubr.bf16.vlgmr.msra.gmra.mxu0 %v23_v9 }
  0xe1   :  { %v122_v11 = vpop.f32.mrf.mxu0 }
  0xe2   :  { %v128_v12 = vadd.f32 %v122_v11, %v22_v10 }
  0xe3   :  { %v194_v13 = vpop.f32.mrf.mxu0 }
  0xe4   :  { %130 = vst.msk [vmem:[#allocation2] sm:$0xff] %vm20_vm1, %v128_v12 }
  0xe5   :  { %v125_v14 = vpop.f32.mrf.mxu0 }
  0xe7   :  { %v195_v15 = vpop.f32.mrf.mxu0 }
  0xeb   :  { %v134_v17 = vld [vmem:[#allocation2] sm:$0xff] }
  0xec   :  { %v142_v18 = vadd.f32 %v166_v16, %v134_v17 }
  0xee   :  { %143 = vst.msk [vmem:[#allocation3] sm:$0xff] %vm20_vm1, %v142_v18 }
  0xef   :  { %218 = shalt.err (!%p215_p4)
}
  0xf0   :  { %153 = dma.vmem_to_hbm [thread:$0]  %s151_s5, 128, %s291_s3, [#allocation4]  }
  0xf1   :  { %227 = dma.done.wait [#allocation4], 128  }
  0xf2   :  { %228 = vsyncadd [#allocation4], 4294967168 }
  0xf3   :  { %157 = vsyncpa [#allocation4], 1 }

</bundles_post_ra>
